<compile_context>
chip_gen: v7x
topology: tpu7x:2x2x1
jax: 0.10.0
libtpu: 0.0.40
codegen_flags: <defaults>
</compile_context>

<pallas_src>
import math
from functools import partial

import jax
import jax.numpy as jnp
from jax import lax
from jax.experimental import pallas as pl
from jax.experimental.pallas import tpu as pltpu

LANES = 128


def _i32(c):
    """uint32 constant -> int32 scalar with the same bit pattern."""
    c &= 0xFFFFFFFF
    return jnp.int32(c - (1 << 32) if c >= (1 << 31) else c)


def _round_up(n, m):
    return ((n + m - 1) // m) * m


def _hash32(x):
    # lowbias32 integer hash; int32 add/mul/xor wrap exactly like uint32.
    x = x ^ lax.shift_right_logical(x, 16)
    x = x * _i32(0x7FEB352D)
    x = x ^ lax.shift_right_logical(x, 15)
    x = x * _i32(0x846CA68B)
    x = x ^ lax.shift_right_logical(x, 16)
    return x


def _gaussian_noise_kernel(seed_ref, x_ref, o_ref, *, stddev):
    rt, L = x_ref.shape          # static tile shape; rt is even by construction
    half = rt // 2

    # Global element counter for the first half of this tile (one counter per
    # Box-Muller pair; the pair fills both tile halves).
    row_base = pl.program_id(0) * rt
    rows = lax.broadcasted_iota(jnp.int32, (half, L), 0)
    cols = lax.broadcasted_iota(jnp.int32, (half, L), 1)
    idx = (row_base + rows) * L + cols

    # Mix the user seed with a large odd constant so adjacent seeds give
    # unrelated streams, then hash to get two independent 32-bit draws.
    base = idx + seed_ref[0] * _i32(0x9E3779B9)
    b1 = _hash32(base)
    b2 = _hash32(b1 ^ base ^ _i32(0x68E31DA4))

    # Top 24 bits -> uniform in (0, 1); the +0.5 keeps log(u1) finite.
    inv24 = jnp.float32(1.0 / (1 << 24))
    u1 = (lax.shift_right_logical(b1, 8).astype(jnp.float32) + 0.5) * inv24
    u2 = (lax.shift_right_logical(b2, 8).astype(jnp.float32) + 0.5) * inv24

    # Box-Muller; use BOTH outputs (cos and sin branches).
    r = jnp.sqrt(-2.0 * jnp.log(u1))
    theta = jnp.float32(2.0 * math.pi) * u2
    z0 = r * jnp.cos(theta)
    z1 = r * jnp.sin(theta)

    z = jnp.concatenate([z0, z1], axis=0)                 # (rt, L) std normal
    noise = (jnp.float32(stddev) * z).astype(o_ref.dtype)  # add in x's dtype
    o_ref[...] = x_ref[...] + noise


def gaussian_noise(x, stddev, seed=0):
    """out = x + N(0, stddev^2), matching GaussianNoise.forward (identity if stddev == 0)."""
    if stddev == 0:
        return x

    orig_shape = x.shape
    total = x.size
    itemsize = jnp.dtype(x.dtype).itemsize

    # Row tile: multiple of 2x the sublane-packing factor (so the tile splits
    # cleanly into two halves), sized to ~1 MiB of input per tile.
    sub2 = 2 * 8 * max(1, 4 // itemsize)            # f32 -> 16, bf16 -> 32
    target_rows = max(sub2, (1 << 20) // (LANES * itemsize))
    target_rows = _round_up(target_rows, sub2)

    rows_needed = -(-total // LANES)
    row_tile = min(target_rows, _round_up(rows_needed, sub2))
    rows_padded = _round_up(rows_needed, row_tile)
    padded_total = rows_padded * LANES

    flat = x.reshape(-1)
    if padded_total != total:
        flat = jnp.pad(flat, (0, padded_total - total))
    x2d = flat.reshape(rows_padded, LANES)

    seed_arr = jnp.array([seed], dtype=jnp.int32)
    grid = rows_padded // row_tile

    out2d = pl.pallas_call(
        partial(_gaussian_noise_kernel, stddev=float(stddev)),
        out_shape=jax.ShapeDtypeStruct((rows_padded, LANES), x.dtype),
        grid_spec=pltpu.PrefetchScalarGridSpec(
            num_scalar_prefetch=1,
            grid=(grid,),
            in_specs=[
                pl.BlockSpec((row_tile, LANES), lambda i, seed: (i, 0)),
            ],
            out_specs=pl.BlockSpec((row_tile, LANES), lambda i, seed: (i, 0)),
        ),
        compiler_params=pltpu.CompilerParams(
            dimension_semantics=("parallel",),
        ),
    )(seed_arr, x2d)

    out_flat = out2d.reshape(-1)
    if padded_total != total:
        out_flat = out_flat[:total]
    return out_flat.reshape(orig_shape)


if __name__ == "__main__":
    key = jax.random.PRNGKey(0)
    # NCHW input, matching the PyTorch convention.
    x = jax.random.normal(key, (2, 4, 16, 16), dtype=jnp.float32)

    stddev = 0.1
    y = jax.block_until_ready(gaussian_noise(x, stddev, seed=0))
    assert y.shape == x.shape and y.dtype == x.dtype

    diff = y - x
    assert float(jnp.max(jnp.abs(diff))) > 0.0
    assert 0.05 < float(jnp.std(diff)) < 0.2          # noise scale ~ stddev
    assert abs(float(jnp.mean(diff))) < 0.02          # roughly zero mean

    # stddev == 0 path must be identity (matches the PyTorch branch).
    y0 = jax.block_until_ready(gaussian_noise(x, 0.0))
    assert bool(jnp.all(y0 == x))

    # Ragged element count (not a multiple of 128) exercises the padded tail.
    x2 = jax.random.normal(jax.random.PRNGKey(1), (3, 5, 7, 11), dtype=jnp.float32)
    y2 = jax.block_until_ready(gaussian_noise(x2, 0.05, seed=7))
    assert y2.shape == x2.shape and y2.dtype == x2.dtype
    assert float(jnp.max(jnp.abs(y2 - x2))) > 0.0

    print("KERNEL_OK")
</pallas_src>

<mosaic_0001>
module attributes {stable_mosaic.version = 11 : i64} {
  func.func @_gaussian_noise_kernel(%arg0: i32, %arg1: memref<1xi32, #tpu.memory_space<smem>>, %arg2: memref<16x128xf32, #tpu.memory_space<vmem>>, %arg3: memref<16x128xf32, #tpu.memory_space<vmem>>) attributes {dimension_semantics = [#tpu.dimension_semantics<parallel>], iteration_bounds = array<i64: 1>, scalar_prefetch = 1 : i64, scratch_operands = 0 : i64, tpu.core_type = #tpu.core_type<tc>, window_params = [{transform_indices = @transform_0, window_bounds = array<i64: 16, 128>}, {transform_indices = @transform_1, window_bounds = array<i64: 16, 128>}]} {
    %c16_i32 = arith.constant 16 : i32
    %0 = arith.muli %arg0, %c16_i32 : i32
    %1 = tpu.iota {dimensions = array<i32: 0>} : vector<8x128xi32>
    %2 = tpu.iota {dimensions = array<i32: 1>} : vector<8x128xi32>
    %3 = vector.broadcast %0 : i32 to vector<8x128xi32>
    %4 = arith.addi %3, %1 : vector<8x128xi32>
    %c128_i32 = arith.constant 128 : i32
    %5 = vector.broadcast %c128_i32 : i32 to vector<8x128xi32>
    %6 = arith.muli %4, %5 : vector<8x128xi32>
    %7 = arith.addi %6, %2 : vector<8x128xi32>
    %c0 = arith.constant 0 : index
    %8 = memref.load %arg1[%c0] : memref<1xi32, #tpu.memory_space<smem>>
    %c-1640531527_i32 = arith.constant -1640531527 : i32
    %9 = arith.muli %8, %c-1640531527_i32 : i32
    %10 = vector.broadcast %9 : i32 to vector<8x128xi32>
    %11 = arith.addi %7, %10 : vector<8x128xi32>
    %c16_i32_0 = arith.constant 16 : i32
    %12 = vector.broadcast %c16_i32_0 : i32 to vector<8x128xi32>
    %13 = arith.shrui %11, %12 : vector<8x128xi32>
    %14 = arith.xori %11, %13 : vector<8x128xi32>
    %c2146121005_i32 = arith.constant 2146121005 : i32
    %15 = vector.broadcast %c2146121005_i32 : i32 to vector<8x128xi32>
    %16 = arith.muli %14, %15 : vector<8x128xi32>
    %c15_i32 = arith.constant 15 : i32
    %17 = vector.broadcast %c15_i32 : i32 to vector<8x128xi32>
    %18 = arith.shrui %16, %17 : vector<8x128xi32>
    %19 = arith.xori %16, %18 : vector<8x128xi32>
    %c-2073254261_i32 = arith.constant -2073254261 : i32
    %20 = vector.broadcast %c-2073254261_i32 : i32 to vector<8x128xi32>
    %21 = arith.muli %19, %20 : vector<8x128xi32>
    %c16_i32_1 = arith.constant 16 : i32
    %22 = vector.broadcast %c16_i32_1 : i32 to vector<8x128xi32>
    %23 = arith.shrui %21, %22 : vector<8x128xi32>
    %24 = arith.xori %21, %23 : vector<8x128xi32>
    %25 = arith.xori %24, %11 : vector<8x128xi32>
    %c1759714724_i32 = arith.constant 1759714724 : i32
    %26 = vector.broadcast %c1759714724_i32 : i32 to vector<8x128xi32>
    %27 = arith.xori %25, %26 : vector<8x128xi32>
    %c16_i32_2 = arith.constant 16 : i32
    %28 = vector.broadcast %c16_i32_2 : i32 to vector<8x128xi32>
    %29 = arith.shrui %27, %28 : vector<8x128xi32>
    %30 = arith.xori %27, %29 : vector<8x128xi32>
    %c2146121005_i32_3 = arith.constant 2146121005 : i32
    %31 = vector.broadcast %c2146121005_i32_3 : i32 to vector<8x128xi32>
    %32 = arith.muli %30, %31 : vector<8x128xi32>
    %c15_i32_4 = arith.constant 15 : i32
    %33 = vector.broadcast %c15_i32_4 : i32 to vector<8x128xi32>
    %34 = arith.shrui %32, %33 : vector<8x128xi32>
    %35 = arith.xori %32, %34 : vector<8x128xi32>
    %c-2073254261_i32_5 = arith.constant -2073254261 : i32
    %36 = vector.broadcast %c-2073254261_i32_5 : i32 to vector<8x128xi32>
    %37 = arith.muli %35, %36 : vector<8x128xi32>
    %c16_i32_6 = arith.constant 16 : i32
    %38 = vector.broadcast %c16_i32_6 : i32 to vector<8x128xi32>
    %39 = arith.shrui %37, %38 : vector<8x128xi32>
    %40 = arith.xori %37, %39 : vector<8x128xi32>
    %c8_i32 = arith.constant 8 : i32
    %41 = vector.broadcast %c8_i32 : i32 to vector<8x128xi32>
    %42 = arith.shrui %24, %41 : vector<8x128xi32>
    %43 = arith.sitofp %42 : vector<8x128xi32> to vector<8x128xf32>
    %cst = arith.constant 5.000000e-01 : f32
    %44 = vector.broadcast %cst : f32 to vector<8x128xf32>
    %45 = arith.addf %43, %44 : vector<8x128xf32>
    %cst_7 = arith.constant 5.96046448E-8 : f32
    %46 = vector.broadcast %cst_7 : f32 to vector<8x128xf32>
    %47 = arith.mulf %45, %46 : vector<8x128xf32>
    %c8_i32_8 = arith.constant 8 : i32
    %48 = vector.broadcast %c8_i32_8 : i32 to vector<8x128xi32>
    %49 = arith.shrui %40, %48 : vector<8x128xi32>
    %50 = arith.sitofp %49 : vector<8x128xi32> to vector<8x128xf32>
    %cst_9 = arith.constant 5.000000e-01 : f32
    %51 = vector.broadcast %cst_9 : f32 to vector<8x128xf32>
    %52 = arith.addf %50, %51 : vector<8x128xf32>
    %cst_10 = arith.constant 5.96046448E-8 : f32
    %53 = vector.broadcast %cst_10 : f32 to vector<8x128xf32>
    %54 = arith.mulf %52, %53 : vector<8x128xf32>
    %55 = math.log %47 : vector<8x128xf32>
    %cst_11 = arith.constant -2.000000e+00 : f32
    %56 = vector.broadcast %cst_11 : f32 to vector<8x128xf32>
    %57 = arith.mulf %56, %55 : vector<8x128xf32>
    %58 = math.sqrt %57 : vector<8x128xf32>
    %cst_12 = arith.constant 6.28318548 : f32
    %59 = vector.broadcast %cst_12 : f32 to vector<8x128xf32>
    %60 = arith.mulf %59, %54 : vector<8x128xf32>
    %61 = math.cos %60 : vector<8x128xf32>
    %62 = arith.mulf %58, %61 : vector<8x128xf32>
    %63 = math.sin %60 : vector<8x128xf32>
    %64 = arith.mulf %58, %63 : vector<8x128xf32>
    %65 = tpu.concatenate %62, %64 in 0 : vector<8x128xf32>, vector<8x128xf32> -> vector<16x128xf32>
    %cst_13 = arith.constant 1.000000e-01 : f32
    %66 = vector.broadcast %cst_13 : f32 to vector<16x128xf32>
    %67 = arith.mulf %66, %65 : vector<16x128xf32>
    %c0_14 = arith.constant 0 : index
    %c0_15 = arith.constant 0 : index
    %68 = vector.load %arg2[%c0_14, %c0_15] : memref<16x128xf32, #tpu.memory_space<vmem>>, vector<16x128xf32>
    %69 = arith.addf %68, %67 : vector<16x128xf32>
    %c0_16 = arith.constant 0 : index
    %c0_17 = arith.constant 0 : index
    %70 = vector.load %arg3[%c0_16, %c0_17] : memref<16x128xf32, #tpu.memory_space<vmem>>, vector<16x128xf32>
    tpu.vector_store %arg3[%c0_16, %c0_17], %69 {strides = array<i32>} : memref<16x128xf32, #tpu.memory_space<vmem>>, vector<16x128xf32>,
    return
  }
  func.func @transform_0(%arg0: i32, %arg1: memref<1xi32, #tpu.memory_space<smem>>) -> (i32, i32) {
    %c0_i32 = arith.constant 0 : i32
    %c0_i32_0 = arith.constant 0 : i32
    return %arg0, %c0_i32 : i32, i32
  }
  func.func @transform_1(%arg0: i32, %arg1: memref<1xi32, #tpu.memory_space<smem>>) -> (i32, i32) {
    %c0_i32 = arith.constant 0 : i32
    %c0_i32_0 = arith.constant 0 : i32
    return %arg0, %c0_i32 : i32, i32
  }
}

</mosaic_0001>

<bundles_post_ra>
// kernel: tpu_custom_call.1
= control target key start
LH: loop header
LB: loop body
LE: loop exit
PB: predicated region body
PF: predicated region fallthrough
CT: control target
= control target key end

     0   :  { %8 = vsyncpa [#allocation5], 0  ;;  %s470_s0 = inlined_call_operand.<no memory space> [shape: s32[1], index: 0, kind: input, shape index: {}]   ;;  %s471_s1 = inlined_call_operand.hbm [shape: f32[16,128], index: 1, kind: input, shape index: {}]   ;;  %s472_s2 = inlined_call_operand.hbm [shape: f32[16,128], index: 2, kind: output, shape index: {}]  }
   0x1   :  { %9 = vsyncpa [#allocation6], 0  ;;  %s387_s9 = smov [#allocation4]   ;;  %s339_s13 = scalar_lea.hbm %s471_s1, 256 }
   0x2   :  { %s15_s10 = sshll.u32 %s387_s9, 4  ;;  %p340_p0 = scmp.ne.s32.totalorder %s471_s1, %s339_s13  ;;  %s16_s10 = int_to_ptr.vmem [resolvable:$true] %s15_s10 }
   0x3   :  { %p343_p1 = scmp.lt.u32.totalorder %s339_s13, %s471_s1 }
   0x5   :  { %p345_p2 = pnand %p343_p1, %p340_p0 }
   0x7   :  { %348 = shalt.err (!%p345_p2)
}
   0x8   :  { %s349_s18 = scalar_lea.vmem %s16_s10, 256  ;;  %p354_p4 = scmp.lt.s32.totalorder %s16_s10, %s16_s10 }
   0x9   :  { %p350_p3 = scmp.ne.s32.totalorder %s16_s10, %s349_s18  ;;  %p355_p5 = scmp.lt.s32.totalorder %s349_s18, %s349_s18 }
   0xb   :  { %p356_p6 = por %p355_p5, %p354_p4 }
   0xd   :  { %p357_p7 = pnand %p356_p6, %p350_p3 }
   0xf   :  { %360 = shalt.err (!%p357_p7)
}
  0x10   :  { %s388_s19 = smov 128   ;;  %s389_s20 = smov 8  }
  0x11   :  { %21 = dma.hbm_to_vmem [thread:$0]  %s471_s1, 256, %s16_s10, [#allocation5], %s388_s19, %s388_s19, %s389_s20  }
  0x12   :  { %383 = dma.done.wait [#allocation5], 256  }
  0x13   :  { %384 = vsyncadd [#allocation5], 4294967040  ;;  %v26_v0 = vlaneseq  ;;  %s35_s25 = smul.u32 2654435769, %s470_s0  ;;  %v390_v41 = vmov 683565275  }
  0x14   :  { %v391_v43 = vmov 2475754826   ;;  %v392_v45 = vmov 2131351028   ;;  %v393_v47 = vmov 2102212464  }
  0x15   :  { %v27_v1 = vshrl.u32 %v26_v0, 7  ;;  %v29_v2 = vand.u32 127, %v26_v0  ;;  %v36_v4 = vstv %s35_s25  ;;  %v394_v49 = vmov 920167782   ;;  %s396_s0 = smov [#allocation7]  }
  0x16   :  { %v395_v56 = vmov 1326507024   ;;  %s297_s1 = sshll.u32 %s396_s0, 4  ;;  %s298_s1 = int_to_ptr.vmem [resolvable:$true] %s297_s1 }
  0x17   :  { %v32_v3 = vmul.u32 128, %v27_v1  ;;  %s361_s26 = scalar_lea.vmem %s298_s1, 256  ;;  %p366_p9 = scmp.lt.s32.totalorder %s298_s1, %s298_s1 }
  0x18   :  { %p362_p8 = scmp.ne.s32.totalorder %s298_s1, %s361_s26  ;;  %p367_p10 = scmp.lt.s32.totalorder %s361_s26, %s361_s26 }
  0x19   :  { %v33_v5 = vadd.s32 %v32_v3, %v29_v2 }
  0x1a   :  { %p368_p11 = por %p367_p10, %p366_p9 }
  0x1b   :  { %v37_v6 = vadd.s32 %v36_v4, %v33_v5 }
  0x1c   :  { %p369_p12 = pnand %p368_p11, %p362_p8 }
  0x1d   :  { %v38_v7 = vshrl.u32 %v37_v6, 16 }
  0x1f   :  { %v39_v8 = vxor.u32 %v38_v7, %v37_v6 }
  0x21   :  { %v40_v9 = vmul.u32 2146121005, %v39_v8 }
  0x23   :  { %v41_v10 = vshrl.u32 %v40_v9, 15 }
  0x25   :  { %v42_v11 = vxor.u32 %v41_v10, %v40_v9 }
  0x27   :  { %v43_v12 = vmul.u32 2221713035, %v42_v11 }
  0x29   :  { %v44_v13 = vshrl.u32 %v43_v12, 16 }
  0x2b   :  { %v430_v14 = vxor.u32 %v44_v13, %v43_v12 }
  0x2d   :  { %v46_v15 = vxor.u32 %v430_v14, %v37_v6  ;;  %v56_v9 = vshrl.u32 %v430_v14, 8 }
  0x2f   :  { %v47_v16 = vxor.u32 1759714724, %v46_v15 }
  0x31   :  { %v48_v17 = vshrl.u32 %v47_v16, 16 }
  0x33   :  { %v49_v18 = vxor.u32 %v48_v17, %v47_v16 }
  0x35   :  { %v50_v19 = vmul.u32 2146121005, %v49_v18 }
  0x37   :  { %v51_v20 = vshrl.u32 %v50_v19, 15 }
  0x39   :  { %v52_v21 = vxor.u32 %v51_v20, %v50_v19  ;;  %v57_v19 = vcvt.s32.f32 %v56_v9 }
  0x3b   :  { %v53_v22 = vmul.u32 2221713035, %v52_v21 }
  0x3d   :  { %v54_v23 = vshrl.u32 %v53_v22, 16 }
  0x3f   :  { %v55_v24 = vxor.u32 %v54_v23, %v53_v22  ;;  %v58_v23 = vadd.f32 0.5, %v57_v19 }
  0x41   :  { %v60_v25 = vshrl.u32 %v55_v24, 8 }
  0x43   :  { %v61_v26 = vcvt.s32.f32 %v60_v25  ;;  %v59_v25 = vmul.f32 5.9604645e-08, %v58_v23 }
  0x45   :  { %v62_v27 = vadd.f32 0.5, %v61_v26  ;;  %331 = vlog2.f32 %v59_v25 }
  0x47   :  { %v63_v28 = vmul.f32 5.9604645e-08, %v62_v27 }
  0x49   :  { %v433_v29 = vmul.f32 6.2831855, %v63_v28 }
  0x4b   :  { %v78_v30 = vand.u32 2139095040, %v433_v29  ;;  %v75_v32 = vand.u32 2147483647, %v433_v29  ;;  %vm77_vm7 = vcmp.lt.s32.totalorder %v433_v29, 0 }
  0x4d   :  { %v79_v31 = vshrl.u32 %v78_v30, 23  ;;  %v82_v35 = vand.u32 8388607, %v75_v32  ;;  %vm76_vm8 = vcmp.le.f32.partialorder %v75_v32, 0.7853982 }
  0x4f   :  { %v309_v33 = vadd.s32 4294967169, %v79_v31  ;;  %v83_v38 = vor.u32 8388608, %v82_v35  ;;  %v332_v35 = vpop.eup %331 }
  0x51   :  { %v85_v34 = vadd.s32 1, %v309_v33  ;;  %v123_v58 = vshll.u32 %v83_v38, 8 }
  0x53   :  { %vm86_vm0 = vcmp.gt.s32.totalorder %v85_v34, 0 }
  0x54   :  { %v87_v36 = vsel %vm86_vm0, %v85_v34, 0 }
  0x55   :  { %v89_v37 = vand.u32 31, %v87_v36  ;;  %v88_v39 = vshrl.u32 %v87_v36, 5 }
  0x57   :  { %v90_v40 = vsub.s32 32, %v89_v37  ;;  %v92_v42 = vshll.u32 %v390_v41, %v89_v37  ;;  %v95_v44 = vshll.u32 %v391_v43, %v89_v37  ;;  %v98_v46 = vshll.u32 %v392_v45, %v89_v37 }
  0x58   :  { %v101_v48 = vshll.u32 %v393_v47, %v89_v37  ;;  %v104_v50 = vshll.u32 %v394_v49, %v89_v37  ;;  %vm107_vm1 = vcmp.lt.s32.totalorder %v88_v39, 1  ;;  %vm110_vm2 = vcmp.lt.s32.totalorder %v88_v39, 4 }
  0x59   :  { %v91_v51 = vshrl.u32 %v390_v41, %v90_v40  ;;  %v93_v52 = vshrl.u32 %v391_v43, %v90_v40  ;;  %v96_v53 = vshrl.u32 %v392_v45, %v90_v40  ;;  %v99_v54 = vshrl.u32 %v393_v47, %v90_v40 }
  0x5a   :  { %v102_v55 = vshrl.u32 %v394_v49, %v90_v40  ;;  %v105_v57 = vshrl.u32 %v395_v56, %v90_v40  ;;  %vm108_vm3 = vcmp.lt.s32.totalorder %v88_v39, 2  ;;  %vm109_vm4 = vcmp.lt.s32.totalorder %v88_v39, 3 }
  0x5b   :  { %v94_v59 = vor.u32 %v93_v52, %v92_v42  ;;  %v97_v60 = vor.u32 %v96_v53, %v95_v44  ;;  %v100_v61 = vor.u32 %v99_v54, %v98_v46  ;;  %v65_v40 = vmul.f32 0.6931472, %v332_v35 }
  0x5c   :  { %v103_v62 = vor.u32 %v102_v55, %v101_v48  ;;  %v106_v63 = vor.u32 %v105_v57, %v104_v50 }
  0x5d   :  { %v111_v0 = vsel %vm107_vm1, %v91_v51, %v94_v59  ;;  %v112_v1 = vsel %vm110_vm2, %v100_v61, 2102212464  ;;  %v115_v2 = vsel %vm107_vm1, %v94_v59, %v97_v60  ;;  %v119_v3 = vsel %vm107_vm1, %v97_v60, %v100_v61 }
  0x5e   :  { %v113_v4 = vsel %vm109_vm4, %v97_v60, %v112_v1  ;;  %v116_v5 = vsel %vm110_vm2, %v103_v62, 920167782  ;;  %v120_v6 = vsel %vm110_vm2, %v106_v63, 1326507024  ;;  %v66_v45 = vmul.f32 -2.0, %v65_v40 }
  0x5f   :  { %v117_v7 = vsel %vm109_vm4, %v100_v61, %v116_v5  ;;  %v121_v8 = vsel %vm109_vm4, %v103_v62, %v120_v6  ;;  %v114_v10 = vsel %vm108_vm3, %v111_v0, %v113_v4  ;;  %vm167_vm1 = vweird.f32 %v433_v29 }
  0x60   :  { %v118_v11 = vsel %vm108_vm3, %v115_v2, %v117_v7  ;;  %v122_v12 = vsel %vm108_vm3, %v119_v3, %v121_v8  ;;  %v130_v18 = vmul.u32 %v123_v58, %v114_v10  ;;  %333 = vrsqrt.f32 %v66_v45 }
  0x61   :  { %v440_v13 = vmul.u32.u64.low %v123_v58, %v122_v12  ;;  %v441_v15 = vmul.u32.u64.high %v123_v58, %v122_v12, %v440_v13  ;;  %v443_v16 = vmul.u32.u64.low %v123_v58, %v118_v11  ;;  %v444_v17 = vmul.u32.u64.high %v123_v58, %v118_v11, %v443_v16 }
  0x62   :  { %vm69_vm9 = vcmp.eq.f32.partialorder %v66_v45, inf  ;;  %vm71_vm10 = vcmp.eq.f32.partialorder %v66_v45, 0.0  ;;  %v72_v62 = vand.u32 2147483648, %v66_v45  ;;  %v286_v13 = vld [vmem:[#allocation4] sm:$0xff] }
  0x63   :  { %vm132_vm5 = vc.u32 %v441_v15, %v443_v16  ;;  %v133_v20 = vadd.s32 1, %v444_v17  ;;  %v131_v34 = vadd.s32 %v443_v16, %v441_v15  ;;  %v287_v15 = vld [vmem:[#allocation4 + $0x8] sm:$0xff] }
  0x65   :  { %v134_v21 = vsel %vm132_vm5, %v133_v20, %v444_v17 }
  0x66   :  { %v135_v22 = vadd.s32 %v134_v21, %v130_v18 }
  0x68   :  { %v136_v14 = vadd.s32 536870912, %v135_v22 }
  0x6a   :  { %v137_v24 = vshrl.u32 %v136_v14, 30  ;;  %v334_v57 = vpop.eup %333 }
  0x6b   :  { %v68_v60 = vmul.f32 %v334_v57, %v66_v45 }
  0x6c   :  { %v138_v26 = vshll.u32 %v137_v24, 30  ;;  %v161_v49 = vsub.s32 4, %v137_v24 }
  0x6d   :  { %v70_v63 = vsel %vm69_vm9, %v66_v45, %v68_v60 }
  0x6e   :  { %v139_v27 = vsub.s32 %v135_v22, %v138_v26  ;;  %v162_v52 = vsel %vm77_vm7, %v161_v49, %v137_v24  ;;  %v73_v4 = vsel %vm71_vm10, %v72_v62, %v70_v63 }
  0x6f   :  { %v164_v55 = vsel %vm76_vm8, 0, %v162_v52 }
  0x70   :  { %v141_v28 = vsub.s32 0, %v139_v27  ;;  %v272_v56 = vadd.s32 3, %v164_v55  ;;  %v168_v58 = vand.u32 3, %v164_v55 }
  0x72   :  { %v310_v30 = vmin.u32 %v141_v28, %v139_v27  ;;  %v273_v59 = vand.u32 3, %v272_v56  ;;  %vm173_vm11 = vcmp.eq.s32.totalorder %v168_v58, 2  ;;  %vm170_vm13 = vcmp.eq.s32.totalorder %v168_v58, 0 }
  0x73   :  { %vm169_vm15 = vcmp.lt.s32.totalorder %v168_v58, 2 }
  0x74   :  { %v143_v31 = vclz %v310_v30  ;;  %vm278_vm12 = vcmp.eq.s32.totalorder %v273_v59, 2  ;;  %vm275_vm14 = vcmp.eq.s32.totalorder %v273_v59, 0  ;;  %vm274_vm0 = vcmp.lt.s32.totalorder %v273_v59, 2 }
  0x76   :  { %v311_v33 = vadd.s32 4294967294, %v143_v31 }
  0x78   :  { %vm312_vm6 = vcmp.lt.s32.totalorder %v311_v33, 0 }
  0x79   :  { %v146_v36 = vsel %vm312_vm6, 0, %v311_v33 }
  0x7a   :  { %v147_v37 = vsub.s32 32, %v146_v36  ;;  %v148_v38 = vshll.u32 %v139_v27, %v146_v36  ;;  %v151_v39 = vsub.s32 4294967266, %v146_v36 }
  0x7c   :  { %v149_v41 = vshrl.u32 %v131_v34, %v147_v37  ;;  %v152_v42 = vadd.s32 127, %v151_v39 }
  0x7e   :  { %v150_v43 = vor.u32 %v149_v41, %v148_v38  ;;  %v153_v44 = vshll.u32 %v152_v42, 23 }
  0x80   :  { %v154_v46 = vor.u32 4788187, %v153_v44  ;;  %v157_v47 = vcvt.s32.f32 %v150_v43 }
  0x82   :  { %v155_v48 = vand.u32 2147483647, %v154_v46 }
  0x84   :  { %v158_v50 = vmul.f32 %v157_v47, %v155_v48 }
  0x86   :  { %v159_v51 = vxor.u32 2147483648, %v158_v50 }
  0x88   :  { %v160_v53 = vsel %vm77_vm7, %v159_v51, %v158_v50 }
  0x89   :  { %v163_v54 = vsel %vm76_vm8, %v433_v29, %v160_v53 }
  0x8a   :  { %335 = vcosq.f32 %v163_v54 }
  0x8b   :  { %337 = vsinq.f32 %v163_v54 }
  0x94   :  { %v336_v61 = vpop.eup %335 }
  0x95   :  { %v338_v32 = vpop.eup %337  ;;  %v174_v0 = vxor.u32 2147483648, %v336_v61 }
  0x96   :  { %v171_v1 = vxor.u32 2147483648, %v338_v32 }
  0x97   :  { %v175_v2 = vsel %vm173_vm11, %v174_v0, %v338_v32  ;;  %v280_v3 = vsel %vm278_vm12, %v174_v0, %v338_v32 }
  0x98   :  { %v172_v5 = vsel %vm170_vm13, %v336_v61, %v171_v1  ;;  %v277_v6 = vsel %vm275_vm14, %v336_v61, %v171_v1 }
  0x99   :  { %v176_v7 = vsel %vm169_vm15, %v172_v5, %v175_v2  ;;  %v281_v8 = vsel %vm274_vm0, %v277_v6, %v280_v3 }
  0x9a   :  { %v177_v9 = vsel %vm167_vm1, nan, %v176_v7  ;;  %v282_v10 = vsel %vm167_vm1, nan, %v281_v8 }
  0x9b   :  { %v178_v11 = vmul.f32 %v177_v9, %v73_v4  ;;  %v283_v12 = vmul.f32 %v282_v10, %v73_v4 }
  0x9d   :  { %v284_v16 = vmul.f32 0.1, %v178_v11  ;;  %v285_v17 = vmul.f32 0.1, %v283_v12 }
  0x9f   :  { %v288_v18 = vadd.f32 %v286_v13, %v284_v16  ;;  %v289_v19 = vadd.f32 %v287_v15, %v285_v17 }
  0xa1   :  { %290 = vst [vmem:[#allocation7] sm:$0xff] %v288_v18  ;;  %291 = vst [vmem:[#allocation7 + $0x8] sm:$0xff] %v289_v19 }
  0xa2   :  { %372 = shalt.err (!%p369_p12)
}
  0xa3   :  { %s373_s29 = scalar_lea.hbm %s472_s2, 256 }
  0xa4   :  { %p374_p13 = scmp.ne.s32.totalorder %s472_s2, %s373_s29  ;;  %p377_p0 = scmp.lt.u32.totalorder %s373_s29, %s472_s2 }
  0xa6   :  { %p379_p1 = pnand %p377_p0, %p374_p13 }
  0xa8   :  { %382 = shalt.err (!%p379_p1)
}
  0xa9   :  { %303 = dma.vmem_to_hbm [thread:$0]  %s298_s1, 256, %s472_s2, [#allocation6], %s388_s19, %s388_s19, %s389_s20  }
  0xaa   :  { %385 = dma.done.wait [#allocation6], 256  }
  0xab   :  { %386 = vsyncadd [#allocation6], 4294967040 }
  0xac   :  { %307 = vsyncpa [#allocation5], 1 }
  0xad   :  { %308 = vsyncpa [#allocation6], 1 }

</bundles_post_ra>
